<compile_context>
chip_gen: v6e
topology: v6e:2x2x1
jax: 0.10.0
libtpu: 0.0.40
codegen_flags: <defaults>
</compile_context>

<pallas_src>
import functools

import jax
import jax.numpy as jnp
from jax.experimental import pallas as pl
from jax.experimental.pallas import tpu as pltpu

NTAPS = 27  # 3 dilations x 3x3 kernel taps


def _round_up(v, m):
    return -(-v // m) * m


def _brem_kernel(x_ref, wf_ref, bf_ref, gw2_ref, gb2_ref, out_ref, patches_ref,
                 *, C, H, W):
    """One grid step = one batch element, channel-major (lanes carry H*W).

    x_ref       : (1, C, HW)   f32  flattened NCHW input (also the residual)
    wf_ref      : (Chp, KPAD)  f32  gw1 @ [w1|w2|w3] fold, K zero-padded to 128
    bf_ref      : (Chp, 1)     f32  gw1 @ (b1+b2+b3) + gb1      (rows >= Ch are 0)
    gw2_ref     : (C, Chp)     f32  second 1x1 conv weight (padded cols are 0)
    gb2_ref     : (C, 1)       f32
    out_ref     : (1, C, HW)   f32
    patches_ref : (KPAD, HW)   f32  VMEM scratch holding the im2col operand
    """
    HW = H * W
    KPAD = patches_ref.shape[0]

    x = x_ref[0]                                            # (C, HW), lane-dense

    # Flat-position index along lanes; column index via bitwise AND (W power of 2).
    pos = jax.lax.broadcasted_iota(jnp.int32, (C, HW), 1)
    if W & (W - 1) == 0:
        col = jnp.bitwise_and(pos, W - 1)
    else:  # not exercised at these shapes
        col = pos % W

    # Each (dilation, ky, kx) tap of the three "same"-padded dilated 3x3 convs is a
    # lane roll of the flat map by dy*W+dx; out-of-image positions are masked to 0,
    # which realises the zero padding without any padded copy of x.
    offsets = [((ky - 1) * d, (kx - 1) * d)
               for d in (1, 2, 3) for ky in range(3) for kx in range(3)]
    for t, (dy, dx) in enumerate(offsets):
        s = dy * W + dx                                     # flat shift of this tap
        shifted = x if s == 0 else pltpu.roll(x, shift=(-s) % HW, axis=1)
        conds = []
        if dy > 0:
            conds.append(pos < (H - dy) * W)                # y + dy < H
        elif dy < 0:
            conds.append(pos >= (-dy) * W)                  # y + dy >= 0
        if dx > 0:
            conds.append(col < W - dx)                      # x + dx < W
        elif dx < 0:
            conds.append(col >= -dx)                        # x + dx >= 0
        if conds:
            mask = functools.reduce(jnp.logical_and, conds)
            tap = jnp.where(mask, shifted, 0.0)
        else:
            tap = shifted
        patches_ref[t * C:(t + 1) * C, :] = tap             # sublane slab, full lanes

    # Zero the K-padding rows every step: the scratch is uninitialised per core and
    # 0 * NaN would poison the matmul even though the padded weight rows are zero.
    if KPAD > NTAPS * C:
        patches_ref[NTAPS * C:KPAD, :] = jnp.zeros((KPAD - NTAPS * C, HW), jnp.float32)

    # Folded (dilated convs + first 1x1 guided conv) -> single K=KPAD MXU matmul,
    # then ReLU and the second 1x1 conv.  f32 operands, f32 accumulate.
    h = jnp.dot(wf_ref[...], patches_ref[...],
                preferred_element_type=jnp.float32)          # (Chp, HW)
    h = jnp.maximum(h + bf_ref[...], 0.0)
    refined = jnp.dot(gw2_ref[...], h,
                      preferred_element_type=jnp.float32)    # (C, HW)
    refined = refined + gb2_ref[...]

    # TODO(synk): nn.Dropout(0.3) is treated as inference-mode identity (no RNG mask).
    out_ref[0] = (x + refined).astype(out_ref.dtype)


def _make_call(N, C, H, W, chp, kpad, dtype):
    HW = H * W

    def const_spec(shape):
        return pl.BlockSpec(shape, lambda i: (0,) * len(shape))

    grid_spec = pltpu.PrefetchScalarGridSpec(
        num_scalar_prefetch=0,
        grid=(N,),
        in_specs=[
            pl.BlockSpec((1, C, HW), lambda i: (i, 0, 0)),   # x, read exactly once
            const_spec((chp, kpad)),                         # folded conv weight
            const_spec((chp, 1)),                            # folded bias
            const_spec((C, chp)),                            # gw2
            const_spec((C, 1)),                              # gb2
        ],
        out_specs=pl.BlockSpec((1, C, HW), lambda i: (i, 0, 0)),
        scratch_shapes=[pltpu.VMEM((kpad, HW), jnp.float32)],
    )

    cost = pl.CostEstimate(
        flops=2 * N * HW * (kpad * chp + chp * C) + 4 * N * NTAPS * HW * C,
        transcendentals=0,
        bytes_accessed=8 * N * C * HW + 4 * (chp * kpad + chp + C * chp + C),
    )

    kernel = functools.partial(_brem_kernel, C=C, H=H, W=W)
    return pl.pallas_call(
        kernel,
        out_shape=jax.ShapeDtypeStruct((N, C, HW), dtype),
        grid_spec=grid_spec,
        compiler_params=pltpu.CompilerParams(
            dimension_semantics=("parallel",)),              # megacore-shard batch
        cost_estimate=cost,
    )


@jax.jit
def boundary_refine(x_nchw, kparams):
    """NCHW forward pass (matches the PyTorch module's input layout)."""
    N, C, H, W = x_nchw.shape
    chp, kpad = kparams["wf"].shape
    call = _make_call(N, C, H, W, chp, kpad, x_nchw.dtype)
    out = call(x_nchw.reshape(N, C, H * W),                  # free metadata reshape
               kparams["wf"], kparams["bf"], kparams["gw2"], kparams["gb2"])
    return out.reshape(N, C, H, W)                           # free metadata reshape


def prepare_kernel_params(params):
    """Fold PyTorch-layout weights into the kernel's packed channel-major forms."""
    ch, C = params["gw1"].shape                              # gw1: (C//2, C)
    # Wcat[co, (d_idx*9 + ky*3 + kx)*C + ci] = w_d[co, ci, ky, kx]   (OIHW -> O,(H W I))
    wcat = jnp.concatenate(
        [jnp.transpose(params[f"w{d}"], (0, 2, 3, 1)).reshape(C, 9 * C)
         for d in (1, 2, 3)], axis=1)                        # (C, 27C)
    bsum = (params["b1"] + params["b2"] + params["b3"]).reshape(C, 1)

    # Fold the first 1x1 guided conv into the dilated-conv weights (all in f32):
    #   h = gw1 @ (Wcat @ P + bsum) + gb1 = (gw1 @ Wcat) @ P + (gw1 @ bsum + gb1)
    wf = params["gw1"] @ wcat                                # (C//2, 27C)
    bf = params["gw1"] @ bsum + params["gb1"].reshape(ch, 1)

    kpad = _round_up(NTAPS * C, 128)                         # MXU-aligned contraction
    chp = _round_up(ch, 8)                                   # sublane-aligned hidden dim
    # Zero padding of the hidden dim is exact: padded rows give relu(0)=0 and the
    # matching gw2 columns are zero.
    wf = jnp.pad(wf, ((0, chp - ch), (0, kpad - NTAPS * C)))
    bf = jnp.pad(bf, ((0, chp - ch), (0, 0)))
    gw2 = jnp.pad(params["gw2"], ((0, 0), (0, chp - ch)))    # (C, Chp)
    return {"wf": wf, "bf": bf, "gw2": gw2, "gb2": params["gb2"].reshape(C, 1)}


def _reference(x, params):
    """Pure-JAX f32 reference of the PyTorch module (NCHW / OIHW, eval mode)."""
    dn = ("NCHW", "OIHW", "NCHW")
    hi = jax.lax.Precision.HIGHEST
    edges = 0.0
    for d in (1, 2, 3):
        y = jax.lax.conv_general_dilated(
            x, params[f"w{d}"], window_strides=(1, 1), padding=[(d, d), (d, d)],
            rhs_dilation=(d, d), dimension_numbers=dn, precision=hi)
        edges = edges + y + params[f"b{d}"].reshape(1, -1, 1, 1)
    h = jnp.einsum("oc,nchw->nohw", params["gw1"], edges, precision=hi)
    h = jax.nn.relu(h + params["gb1"].reshape(1, -1, 1, 1))
    refined = jnp.einsum("oc,nchw->nohw", params["gw2"], h, precision=hi)
    refined = refined + params["gb2"].reshape(1, -1, 1, 1)
    return x + refined


def init_params(key, C):
    ch = C // 2
    ks = jax.random.split(key, 10)
    s3 = 1.0 / (C * 9) ** 0.5                                # ~PyTorch uniform bound
    s1 = 1.0 / C ** 0.5
    s1b = 1.0 / ch ** 0.5
    u = jax.random.uniform
    return {
        "w1": u(ks[0], (C, C, 3, 3), jnp.float32, -s3, s3),  # OIHW (PyTorch layout)
        "b1": u(ks[1], (C,), jnp.float32, -s3, s3),
        "w2": u(ks[2], (C, C, 3, 3), jnp.float32, -s3, s3),
        "b2": u(ks[3], (C,), jnp.float32, -s3, s3),
        "w3": u(ks[4], (C, C, 3, 3), jnp.float32, -s3, s3),
        "b3": u(ks[5], (C,), jnp.float32, -s3, s3),
        "gw1": u(ks[6], (ch, C), jnp.float32, -s1, s1),
        "gb1": u(ks[7], (ch,), jnp.float32, -s1, s1),
        "gw2": u(ks[8], (C, ch), jnp.float32, -s1b, s1b),
        "gb2": u(ks[9], (C,), jnp.float32, -s1b, s1b),
    }


if __name__ == "__main__":
    key = jax.random.PRNGKey(0)
    kx, kp = jax.random.split(key)

    N, C, H, W = 2, 4, 16, 16                                # module input: NCHW
    x = jax.random.normal(kx, (N, C, H, W), jnp.float32)

    params = init_params(kp, C)
    kparams = prepare_kernel_params(params)

    out = jax.block_until_ready(boundary_refine(x, kparams))
    ref = _reference(x, params)

    assert out.shape == (N, C, H, W)
    # Both sides are f32 with f32 accumulation; tolerance only covers MXU pass /
    # accumulation-order differences.
    assert bool(jnp.allclose(out, ref, atol=5e-3, rtol=5e-3)), "mismatch vs JAX reference"

    print("KERNEL_OK")
</pallas_src>

<mosaic_0001>
module attributes {stable_mosaic.version = 11 : i64} {
  func.func @_brem_kernel(%arg0: i32, %arg1: memref<1x4x256xf32, #tpu.memory_space<vmem>>, %arg2: memref<8x128xf32, #tpu.memory_space<vmem>>, %arg3: memref<8x1xf32, #tpu.memory_space<vmem>>, %arg4: memref<4x8xf32, #tpu.memory_space<vmem>>, %arg5: memref<4x1xf32, #tpu.memory_space<vmem>>, %arg6: memref<1x4x256xf32, #tpu.memory_space<vmem>>, %arg7: memref<128x256xf32, #tpu.memory_space<vmem>>) attributes {dimension_semantics = [#tpu.dimension_semantics<parallel>], iteration_bounds = array<i64: 2>, scalar_prefetch = 0 : i64, scratch_operands = 1 : i64, tpu.core_type = #tpu.core_type<tc>, window_params = [{transform_indices = @transform_0, window_bounds = array<i64: 1, 4, 256>}, {pipeline_mode = #tpu.pipeline_mode<synchronous>, transform_indices = @transform_1, window_bounds = array<i64: 8, 128>}, {pipeline_mode = #tpu.pipeline_mode<synchronous>, transform_indices = @transform_2, window_bounds = array<i64: 8, 1>}, {pipeline_mode = #tpu.pipeline_mode<synchronous>, transform_indices = @transform_3, window_bounds = array<i64: 4, 8>}, {pipeline_mode = #tpu.pipeline_mode<synchronous>, transform_indices = @transform_4, window_bounds = array<i64: 4, 1>}, {transform_indices = @transform_5, window_bounds = array<i64: 1, 4, 256>}]} {
    %c0 = arith.constant 0 : index
    %c0_0 = arith.constant 0 : index
    %c0_1 = arith.constant 0 : index
    %0 = vector.load %arg1[%c0, %c0_0, %c0_1] : memref<1x4x256xf32, #tpu.memory_space<vmem>>, vector<1x4x256xf32>
    %1 = vector.shape_cast %0 : vector<1x4x256xf32> to vector<4x256xf32>
    %2 = tpu.iota {dimensions = array<i32: 1>} : vector<4x256xi32>
    %c15_i32 = arith.constant 15 : i32
    %3 = vector.broadcast %c15_i32 : i32 to vector<4x256xi32>
    %4 = arith.andi %2, %3 : vector<4x256xi32>
    %c17_i32 = arith.constant 17 : i32
    %5 = tpu.dynamic_rotate %1 by %c17_i32 dim 1 : vector<4x256xf32>, i32 -> vector<4x256xf32>
    %c16_i32 = arith.constant 16 : i32
    %6 = vector.broadcast %c16_i32 : i32 to vector<4x256xi32>
    %7 = arith.cmpi sge, %2, %6 : vector<4x256xi32>
    %c1_i32 = arith.constant 1 : i32
    %8 = vector.broadcast %c1_i32 : i32 to vector<4x256xi32>
    %9 = arith.cmpi sge, %4, %8 : vector<4x256xi32>
    %10 = arith.andi %7, %9 : vector<4x256xi1>
    %cst = arith.constant 0.000000e+00 : f32
    %11 = vector.broadcast %cst : f32 to vector<4x256xf32>
    %12 = arith.select %10, %5, %11 : vector<4x256xi1>, vector<4x256xf32>
    %c0_2 = arith.constant 0 : index
    %c0_3 = arith.constant 0 : index
    %13 = vector.load %arg7[%c0_2, %c0_3] : memref<128x256xf32, #tpu.memory_space<vmem>>, vector<4x256xf32>
    tpu.vector_store %arg7[%c0_2, %c0_3], %12 {strides = array<i32>} : memref<128x256xf32, #tpu.memory_space<vmem>>, vector<4x256xf32>,
    %c16_i32_4 = arith.constant 16 : i32
    %14 = tpu.dynamic_rotate %1 by %c16_i32_4 dim 1 : vector<4x256xf32>, i32 -> vector<4x256xf32>
    %c16_i32_5 = arith.constant 16 : i32
    %15 = vector.broadcast %c16_i32_5 : i32 to vector<4x256xi32>
    %16 = arith.cmpi sge, %2, %15 : vector<4x256xi32>
    %cst_6 = arith.constant 0.000000e+00 : f32
    %17 = vector.broadcast %cst_6 : f32 to vector<4x256xf32>
    %18 = arith.select %16, %14, %17 : vector<4x256xi1>, vector<4x256xf32>
    %c4 = arith.constant 4 : index
    %c0_7 = arith.constant 0 : index
    %19 = vector.load %arg7[%c4, %c0_7] : memref<128x256xf32, #tpu.memory_space<vmem>>, vector<4x256xf32>
    tpu.vector_store %arg7[%c4, %c0_7], %18 {strides = array<i32>} : memref<128x256xf32, #tpu.memory_space<vmem>>, vector<4x256xf32>,
    %c15_i32_8 = arith.constant 15 : i32
    %20 = tpu.dynamic_rotate %1 by %c15_i32_8 dim 1 : vector<4x256xf32>, i32 -> vector<4x256xf32>
    %c16_i32_9 = arith.constant 16 : i32
    %21 = vector.broadcast %c16_i32_9 : i32 to vector<4x256xi32>
    %22 = arith.cmpi sge, %2, %21 : vector<4x256xi32>
    %c15_i32_10 = arith.constant 15 : i32
    %23 = vector.broadcast %c15_i32_10 : i32 to vector<4x256xi32>
    %24 = arith.cmpi slt, %4, %23 : vector<4x256xi32>
    %25 = arith.andi %22, %24 : vector<4x256xi1>
    %cst_11 = arith.constant 0.000000e+00 : f32
    %26 = vector.broadcast %cst_11 : f32 to vector<4x256xf32>
    %27 = arith.select %25, %20, %26 : vector<4x256xi1>, vector<4x256xf32>
    %c8 = arith.constant 8 : index
    %c0_12 = arith.constant 0 : index
    %28 = vector.load %arg7[%c8, %c0_12] : memref<128x256xf32, #tpu.memory_space<vmem>>, vector<4x256xf32>
    tpu.vector_store %arg7[%c8, %c0_12], %27 {strides = array<i32>} : memref<128x256xf32, #tpu.memory_space<vmem>>, vector<4x256xf32>,
    %c1_i32_13 = arith.constant 1 : i32
    %29 = tpu.dynamic_rotate %1 by %c1_i32_13 dim 1 : vector<4x256xf32>, i32 -> vector<4x256xf32>
    %c1_i32_14 = arith.constant 1 : i32
    %30 = vector.broadcast %c1_i32_14 : i32 to vector<4x256xi32>
    %31 = arith.cmpi sge, %4, %30 : vector<4x256xi32>
    %cst_15 = arith.constant 0.000000e+00 : f32
    %32 = vector.broadcast %cst_15 : f32 to vector<4x256xf32>
    %33 = arith.select %31, %29, %32 : vector<4x256xi1>, vector<4x256xf32>
    %c12 = arith.constant 12 : index
    %c0_16 = arith.constant 0 : index
    %34 = vector.load %arg7[%c12, %c0_16] : memref<128x256xf32, #tpu.memory_space<vmem>>, vector<4x256xf32>
    tpu.vector_store %arg7[%c12, %c0_16], %33 {strides = array<i32>} : memref<128x256xf32, #tpu.memory_space<vmem>>, vector<4x256xf32>,
    %c16 = arith.constant 16 : index
    %c0_17 = arith.constant 0 : index
    %35 = vector.load %arg7[%c16, %c0_17] : memref<128x256xf32, #tpu.memory_space<vmem>>, vector<4x256xf32>
    tpu.vector_store %arg7[%c16, %c0_17], %1 {strides = array<i32>} : memref<128x256xf32, #tpu.memory_space<vmem>>, vector<4x256xf32>,
    %c255_i32 = arith.constant 255 : i32
    %36 = tpu.dynamic_rotate %1 by %c255_i32 dim 1 : vector<4x256xf32>, i32 -> vector<4x256xf32>
    %c15_i32_18 = arith.constant 15 : i32
    %37 = vector.broadcast %c15_i32_18 : i32 to vector<4x256xi32>
    %38 = arith.cmpi slt, %4, %37 : vector<4x256xi32>
    %cst_19 = arith.constant 0.000000e+00 : f32
    %39 = vector.broadcast %cst_19 : f32 to vector<4x256xf32>
    %40 = arith.select %38, %36, %39 : vector<4x256xi1>, vector<4x256xf32>
    %c20 = arith.constant 20 : index
    %c0_20 = arith.constant 0 : index
    %41 = vector.load %arg7[%c20, %c0_20] : memref<128x256xf32, #tpu.memory_space<vmem>>, vector<4x256xf32>
    tpu.vector_store %arg7[%c20, %c0_20], %40 {strides = array<i32>} : memref<128x256xf32, #tpu.memory_space<vmem>>, vector<4x256xf32>,
    %c241_i32 = arith.constant 241 : i32
    %42 = tpu.dynamic_rotate %1 by %c241_i32 dim 1 : vector<4x256xf32>, i32 -> vector<4x256xf32>
    %c240_i32 = arith.constant 240 : i32
    %43 = vector.broadcast %c240_i32 : i32 to vector<4x256xi32>
    %44 = arith.cmpi slt, %2, %43 : vector<4x256xi32>
    %c1_i32_21 = arith.constant 1 : i32
    %45 = vector.broadcast %c1_i32_21 : i32 to vector<4x256xi32>
    %46 = arith.cmpi sge, %4, %45 : vector<4x256xi32>
    %47 = arith.andi %44, %46 : vector<4x256xi1>
    %cst_22 = arith.constant 0.000000e+00 : f32
    %48 = vector.broadcast %cst_22 : f32 to vector<4x256xf32>
    %49 = arith.select %47, %42, %48 : vector<4x256xi1>, vector<4x256xf32>
    %c24 = arith.constant 24 : index
    %c0_23 = arith.constant 0 : index
    %50 = vector.load %arg7[%c24, %c0_23] : memref<128x256xf32, #tpu.memory_space<vmem>>, vector<4x256xf32>
    tpu.vector_store %arg7[%c24, %c0_23], %49 {strides = array<i32>} : memref<128x256xf32, #tpu.memory_space<vmem>>, vector<4x256xf32>,
    %c240_i32_24 = arith.constant 240 : i32
    %51 = tpu.dynamic_rotate %1 by %c240_i32_24 dim 1 : vector<4x256xf32>, i32 -> vector<4x256xf32>
    %c240_i32_25 = arith.constant 240 : i32
    %52 = vector.broadcast %c240_i32_25 : i32 to vector<4x256xi32>
    %53 = arith.cmpi slt, %2, %52 : vector<4x256xi32>
    %cst_26 = arith.constant 0.000000e+00 : f32
    %54 = vector.broadcast %cst_26 : f32 to vector<4x256xf32>
    %55 = arith.select %53, %51, %54 : vector<4x256xi1>, vector<4x256xf32>
    %c28 = arith.constant 28 : index
    %c0_27 = arith.constant 0 : index
    %56 = vector.load %arg7[%c28, %c0_27] : memref<128x256xf32, #tpu.memory_space<vmem>>, vector<4x256xf32>
    tpu.vector_store %arg7[%c28, %c0_27], %55 {strides = array<i32>} : memref<128x256xf32, #tpu.memory_space<vmem>>, vector<4x256xf32>,
    %c239_i32 = arith.constant 239 : i32
    %57 = tpu.dynamic_rotate %1 by %c239_i32 dim 1 : vector<4x256xf32>, i32 -> vector<4x256xf32>
    %c240_i32_28 = arith.constant 240 : i32
    %58 = vector.broadcast %c240_i32_28 : i32 to vector<4x256xi32>
    %59 = arith.cmpi slt, %2, %58 : vector<4x256xi32>
    %c15_i32_29 = arith.constant 15 : i32
    %60 = vector.broadcast %c15_i32_29 : i32 to vector<4x256xi32>
    %61 = arith.cmpi slt, %4, %60 : vector<4x256xi32>
    %62 = arith.andi %59, %61 : vector<4x256xi1>
    %cst_30 = arith.constant 0.000000e+00 : f32
    %63 = vector.broadcast %cst_30 : f32 to vector<4x256xf32>
    %64 = arith.select %62, %57, %63 : vector<4x256xi1>, vector<4x256xf32>
    %c32 = arith.constant 32 : index
    %c0_31 = arith.constant 0 : index
    %65 = vector.load %arg7[%c32, %c0_31] : memref<128x256xf32, #tpu.memory_space<vmem>>, vector<4x256xf32>
    tpu.vector_store %arg7[%c32, %c0_31], %64 {strides = array<i32>} : memref<128x256xf32, #tpu.memory_space<vmem>>, vector<4x256xf32>,
    %c34_i32 = arith.constant 34 : i32
    %66 = tpu.dynamic_rotate %1 by %c34_i32 dim 1 : vector<4x256xf32>, i32 -> vector<4x256xf32>
    %c32_i32 = arith.constant 32 : i32
    %67 = vector.broadcast %c32_i32 : i32 to vector<4x256xi32>
    %68 = arith.cmpi sge, %2, %67 : vector<4x256xi32>
    %c2_i32 = arith.constant 2 : i32
    %69 = vector.broadcast %c2_i32 : i32 to vector<4x256xi32>
    %70 = arith.cmpi sge, %4, %69 : vector<4x256xi32>
    %71 = arith.andi %68, %70 : vector<4x256xi1>
    %cst_32 = arith.constant 0.000000e+00 : f32
    %72 = vector.broadcast %cst_32 : f32 to vector<4x256xf32>
    %73 = arith.select %71, %66, %72 : vector<4x256xi1>, vector<4x256xf32>
    %c36 = arith.constant 36 : index
    %c0_33 = arith.constant 0 : index
    %74 = vector.load %arg7[%c36, %c0_33] : memref<128x256xf32, #tpu.memory_space<vmem>>, vector<4x256xf32>
    tpu.vector_store %arg7[%c36, %c0_33], %73 {strides = array<i32>} : memref<128x256xf32, #tpu.memory_space<vmem>>, vector<4x256xf32>,
    %c32_i32_34 = arith.constant 32 : i32
    %75 = tpu.dynamic_rotate %1 by %c32_i32_34 dim 1 : vector<4x256xf32>, i32 -> vector<4x256xf32>
    %c32_i32_35 = arith.constant 32 : i32
    %76 = vector.broadcast %c32_i32_35 : i32 to vector<4x256xi32>
    %77 = arith.cmpi sge, %2, %76 : vector<4x256xi32>
    %cst_36 = arith.constant 0.000000e+00 : f32
    %78 = vector.broadcast %cst_36 : f32 to vector<4x256xf32>
    %79 = arith.select %77, %75, %78 : vector<4x256xi1>, vector<4x256xf32>
    %c40 = arith.constant 40 : index
    %c0_37 = arith.constant 0 : index
    %80 = vector.load %arg7[%c40, %c0_37] : memref<128x256xf32, #tpu.memory_space<vmem>>, vector<4x256xf32>
    tpu.vector_store %arg7[%c40, %c0_37], %79 {strides = array<i32>} : memref<128x256xf32, #tpu.memory_space<vmem>>, vector<4x256xf32>,
    %c30_i32 = arith.constant 30 : i32
    %81 = tpu.dynamic_rotate %1 by %c30_i32 dim 1 : vector<4x256xf32>, i32 -> vector<4x256xf32>
    %c32_i32_38 = arith.constant 32 : i32
    %82 = vector.broadcast %c32_i32_38 : i32 to vector<4x256xi32>
    %83 = arith.cmpi sge, %2, %82 : vector<4x256xi32>
    %c14_i32 = arith.constant 14 : i32
    %84 = vector.broadcast %c14_i32 : i32 to vector<4x256xi32>
    %85 = arith.cmpi slt, %4, %84 : vector<4x256xi32>
    %86 = arith.andi %83, %85 : vector<4x256xi1>
    %cst_39 = arith.constant 0.000000e+00 : f32
    %87 = vector.broadcast %cst_39 : f32 to vector<4x256xf32>
    %88 = arith.select %86, %81, %87 : vector<4x256xi1>, vector<4x256xf32>
    %c44 = arith.constant 44 : index
    %c0_40 = arith.constant 0 : index
    %89 = vector.load %arg7[%c44, %c0_40] : memref<128x256xf32, #tpu.memory_space<vmem>>, vector<4x256xf32>
    tpu.vector_store %arg7[%c44, %c0_40], %88 {strides = array<i32>} : memref<128x256xf32, #tpu.memory_space<vmem>>, vector<4x256xf32>,
    %c2_i32_41 = arith.constant 2 : i32
    %90 = tpu.dynamic_rotate %1 by %c2_i32_41 dim 1 : vector<4x256xf32>, i32 -> vector<4x256xf32>
    %c2_i32_42 = arith.constant 2 : i32
    %91 = vector.broadcast %c2_i32_42 : i32 to vector<4x256xi32>
    %92 = arith.cmpi sge, %4, %91 : vector<4x256xi32>
    %cst_43 = arith.constant 0.000000e+00 : f32
    %93 = vector.broadcast %cst_43 : f32 to vector<4x256xf32>
    %94 = arith.select %92, %90, %93 : vector<4x256xi1>, vector<4x256xf32>
    %c48 = arith.constant 48 : index
    %c0_44 = arith.constant 0 : index
    %95 = vector.load %arg7[%c48, %c0_44] : memref<128x256xf32, #tpu.memory_space<vmem>>, vector<4x256xf32>
    tpu.vector_store %arg7[%c48, %c0_44], %94 {strides = array<i32>} : memref<128x256xf32, #tpu.memory_space<vmem>>, vector<4x256xf32>,
    %c52 = arith.constant 52 : index
    %c0_45 = arith.constant 0 : index
    %96 = vector.load %arg7[%c52, %c0_45] : memref<128x256xf32, #tpu.memory_space<vmem>>, vector<4x256xf32>
    tpu.vector_store %arg7[%c52, %c0_45], %1 {strides = array<i32>} : memref<128x256xf32, #tpu.memory_space<vmem>>, vector<4x256xf32>,
    %c254_i32 = arith.constant 254 : i32
    %97 = tpu.dynamic_rotate %1 by %c254_i32 dim 1 : vector<4x256xf32>, i32 -> vector<4x256xf32>
    %c14_i32_46 = arith.constant 14 : i32
    %98 = vector.broadcast %c14_i32_46 : i32 to vector<4x256xi32>
    %99 = arith.cmpi slt, %4, %98 : vector<4x256xi32>
    %cst_47 = arith.constant 0.000000e+00 : f32
    %100 = vector.broadcast %cst_47 : f32 to vector<4x256xf32>
    %101 = arith.select %99, %97, %100 : vector<4x256xi1>, vector<4x256xf32>
    %c56 = arith.constant 56 : index
    %c0_48 = arith.constant 0 : index
    %102 = vector.load %arg7[%c56, %c0_48] : memref<128x256xf32, #tpu.memory_space<vmem>>, vector<4x256xf32>
    tpu.vector_store %arg7[%c56, %c0_48], %101 {strides = array<i32>} : memref<128x256xf32, #tpu.memory_space<vmem>>, vector<4x256xf32>,
    %c226_i32 = arith.constant 226 : i32
    %103 = tpu.dynamic_rotate %1 by %c226_i32 dim 1 : vector<4x256xf32>, i32 -> vector<4x256xf32>
    %c224_i32 = arith.constant 224 : i32
    %104 = vector.broadcast %c224_i32 : i32 to vector<4x256xi32>
    %105 = arith.cmpi slt, %2, %104 : vector<4x256xi32>
    %c2_i32_49 = arith.constant 2 : i32
    %106 = vector.broadcast %c2_i32_49 : i32 to vector<4x256xi32>
    %107 = arith.cmpi sge, %4, %106 : vector<4x256xi32>
    %108 = arith.andi %105, %107 : vector<4x256xi1>
    %cst_50 = arith.constant 0.000000e+00 : f32
    %109 = vector.broadcast %cst_50 : f32 to vector<4x256xf32>
    %110 = arith.select %108, %103, %109 : vector<4x256xi1>, vector<4x256xf32>
    %c60 = arith.constant 60 : index
    %c0_51 = arith.constant 0 : index
    %111 = vector.load %arg7[%c60, %c0_51] : memref<128x256xf32, #tpu.memory_space<vmem>>, vector<4x256xf32>
    tpu.vector_store %arg7[%c60, %c0_51], %110 {strides = array<i32>} : memref<128x256xf32, #tpu.memory_space<vmem>>, vector<4x256xf32>,
    %c224_i32_52 = arith.constant 224 : i32
    %112 = tpu.dynamic_rotate %1 by %c224_i32_52 dim 1 : vector<4x256xf32>, i32 -> vector<4x256xf32>
    %c224_i32_53 = arith.constant 224 : i32
    %113 = vector.broadcast %c224_i32_53 : i32 to vector<4x256xi32>
    %114 = arith.cmpi slt, %2, %113 : vector<4x256xi32>
    %cst_54 = arith.constant 0.000000e+00 : f32
    %115 = vector.broadcast %cst_54 : f32 to vector<4x256xf32>
    %116 = arith.select %114, %112, %115 : vector<4x256xi1>, vector<4x256xf32>
    %c64 = arith.constant 64 : index
    %c0_55 = arith.constant 0 : index
    %117 = vector.load %arg7[%c64, %c0_55] : memref<128x256xf32, #tpu.memory_space<vmem>>, vector<4x256xf32>
    tpu.vector_store %arg7[%c64, %c0_55], %116 {strides = array<i32>} : memref<128x256xf32, #tpu.memory_space<vmem>>, vector<4x256xf32>,
    %c222_i32 = arith.constant 222 : i32
    %118 = tpu.dynamic_rotate %1 by %c222_i32 dim 1 : vector<4x256xf32>, i32 -> vector<4x256xf32>
    %c224_i32_56 = arith.constant 224 : i32
    %119 = vector.broadcast %c224_i32_56 : i32 to vector<4x256xi32>
    %120 = arith.cmpi slt, %2, %119 : vector<4x256xi32>
    %c14_i32_57 = arith.constant 14 : i32
    %121 = vector.broadcast %c14_i32_57 : i32 to vector<4x256xi32>
    %122 = arith.cmpi slt, %4, %121 : vector<4x256xi32>
    %123 = arith.andi %120, %122 : vector<4x256xi1>
    %cst_58 = arith.constant 0.000000e+00 : f32
    %124 = vector.broadcast %cst_58 : f32 to vector<4x256xf32>
    %125 = arith.select %123, %118, %124 : vector<4x256xi1>, vector<4x256xf32>
    %c68 = arith.constant 68 : index
    %c0_59 = arith.constant 0 : index
    %126 = vector.load %arg7[%c68, %c0_59] : memref<128x256xf32, #tpu.memory_space<vmem>>, vector<4x256xf32>
    tpu.vector_store %arg7[%c68, %c0_59], %125 {strides = array<i32>} : memref<128x256xf32, #tpu.memory_space<vmem>>, vector<4x256xf32>,
    %c51_i32 = arith.constant 51 : i32
    %127 = tpu.dynamic_rotate %1 by %c51_i32 dim 1 : vector<4x256xf32>, i32 -> vector<4x256xf32>
    %c48_i32 = arith.constant 48 : i32
    %128 = vector.broadcast %c48_i32 : i32 to vector<4x256xi32>
    %129 = arith.cmpi sge, %2, %128 : vector<4x256xi32>
    %c3_i32 = arith.constant 3 : i32
    %130 = vector.broadcast %c3_i32 : i32 to vector<4x256xi32>
    %131 = arith.cmpi sge, %4, %130 : vector<4x256xi32>
    %132 = arith.andi %129, %131 : vector<4x256xi1>
    %cst_60 = arith.constant 0.000000e+00 : f32
    %133 = vector.broadcast %cst_60 : f32 to vector<4x256xf32>
    %134 = arith.select %132, %127, %133 : vector<4x256xi1>, vector<4x256xf32>
    %c72 = arith.constant 72 : index
    %c0_61 = arith.constant 0 : index
    %135 = vector.load %arg7[%c72, %c0_61] : memref<128x256xf32, #tpu.memory_space<vmem>>, vector<4x256xf32>
    tpu.vector_store %arg7[%c72, %c0_61], %134 {strides = array<i32>} : memref<128x256xf32, #tpu.memory_space<vmem>>, vector<4x256xf32>,
    %c48_i32_62 = arith.constant 48 : i32
    %136 = tpu.dynamic_rotate %1 by %c48_i32_62 dim 1 : vector<4x256xf32>, i32 -> vector<4x256xf32>
    %c48_i32_63 = arith.constant 48 : i32
    %137 = vector.broadcast %c48_i32_63 : i32 to vector<4x256xi32>
    %138 = arith.cmpi sge, %2, %137 : vector<4x256xi32>
    %cst_64 = arith.constant 0.000000e+00 : f32
    %139 = vector.broadcast %cst_64 : f32 to vector<4x256xf32>
    %140 = arith.select %138, %136, %139 : vector<4x256xi1>, vector<4x256xf32>
    %c76 = arith.constant 76 : index
    %c0_65 = arith.constant 0 : index
    %141 = vector.load %arg7[%c76, %c0_65] : memref<128x256xf32, #tpu.memory_space<vmem>>, vector<4x256xf32>
    tpu.vector_store %arg7[%c76, %c0_65], %140 {strides = array<i32>} : memref<128x256xf32, #tpu.memory_space<vmem>>, vector<4x256xf32>,
    %c45_i32 = arith.constant 45 : i32
    %142 = tpu.dynamic_rotate %1 by %c45_i32 dim 1 : vector<4x256xf32>, i32 -> vector<4x256xf32>
    %c48_i32_66 = arith.constant 48 : i32
    %143 = vector.broadcast %c48_i32_66 : i32 to vector<4x256xi32>
    %144 = arith.cmpi sge, %2, %143 : vector<4x256xi32>
    %c13_i32 = arith.constant 13 : i32
    %145 = vector.broadcast %c13_i32 : i32 to vector<4x256xi32>
    %146 = arith.cmpi slt, %4, %145 : vector<4x256xi32>
    %147 = arith.andi %144, %146 : vector<4x256xi1>
    %cst_67 = arith.constant 0.000000e+00 : f32
    %148 = vector.broadcast %cst_67 : f32 to vector<4x256xf32>
    %149 = arith.select %147, %142, %148 : vector<4x256xi1>, vector<4x256xf32>
    %c80 = arith.constant 80 : index
    %c0_68 = arith.constant 0 : index
    %150 = vector.load %arg7[%c80, %c0_68] : memref<128x256xf32, #tpu.memory_space<vmem>>, vector<4x256xf32>
    tpu.vector_store %arg7[%c80, %c0_68], %149 {strides = array<i32>} : memref<128x256xf32, #tpu.memory_space<vmem>>, vector<4x256xf32>,
    %c3_i32_69 = arith.constant 3 : i32
    %151 = tpu.dynamic_rotate %1 by %c3_i32_69 dim 1 : vector<4x256xf32>, i32 -> vector<4x256xf32>
    %c3_i32_70 = arith.constant 3 : i32
    %152 = vector.broadcast %c3_i32_70 : i32 to vector<4x256xi32>
    %153 = arith.cmpi sge, %4, %152 : vector<4x256xi32>
    %cst_71 = arith.constant 0.000000e+00 : f32
    %154 = vector.broadcast %cst_71 : f32 to vector<4x256xf32>
    %155 = arith.select %153, %151, %154 : vector<4x256xi1>, vector<4x256xf32>
    %c84 = arith.constant 84 : index
    %c0_72 = arith.constant 0 : index
    %156 = vector.load %arg7[%c84, %c0_72] : memref<128x256xf32, #tpu.memory_space<vmem>>, vector<4x256xf32>
    tpu.vector_store %arg7[%c84, %c0_72], %155 {strides = array<i32>} : memref<128x256xf32, #tpu.memory_space<vmem>>, vector<4x256xf32>,
    %c88 = arith.constant 88 : index
    %c0_73 = arith.constant 0 : index
    %157 = vector.load %arg7[%c88, %c0_73] : memref<128x256xf32, #tpu.memory_space<vmem>>, vector<4x256xf32>
    tpu.vector_store %arg7[%c88, %c0_73], %1 {strides = array<i32>} : memref<128x256xf32, #tpu.memory_space<vmem>>, vector<4x256xf32>,
    %c253_i32 = arith.constant 253 : i32
    %158 = tpu.dynamic_rotate %1 by %c253_i32 dim 1 : vector<4x256xf32>, i32 -> vector<4x256xf32>
    %c13_i32_74 = arith.constant 13 : i32
    %159 = vector.broadcast %c13_i32_74 : i32 to vector<4x256xi32>
    %160 = arith.cmpi slt, %4, %159 : vector<4x256xi32>
    %cst_75 = arith.constant 0.000000e+00 : f32
    %161 = vector.broadcast %cst_75 : f32 to vector<4x256xf32>
    %162 = arith.select %160, %158, %161 : vector<4x256xi1>, vector<4x256xf32>
    %c92 = arith.constant 92 : index
    %c0_76 = arith.constant 0 : index
    %163 = vector.load %arg7[%c92, %c0_76] : memref<128x256xf32, #tpu.memory_space<vmem>>, vector<4x256xf32>
    tpu.vector_store %arg7[%c92, %c0_76], %162 {strides = array<i32>} : memref<128x256xf32, #tpu.memory_space<vmem>>, vector<4x256xf32>,
    %c211_i32 = arith.constant 211 : i32
    %164 = tpu.dynamic_rotate %1 by %c211_i32 dim 1 : vector<4x256xf32>, i32 -> vector<4x256xf32>
    %c208_i32 = arith.constant 208 : i32
    %165 = vector.broadcast %c208_i32 : i32 to vector<4x256xi32>
    %166 = arith.cmpi slt, %2, %165 : vector<4x256xi32>
    %c3_i32_77 = arith.constant 3 : i32
    %167 = vector.broadcast %c3_i32_77 : i32 to vector<4x256xi32>
    %168 = arith.cmpi sge, %4, %167 : vector<4x256xi32>
    %169 = arith.andi %166, %168 : vector<4x256xi1>
    %cst_78 = arith.constant 0.000000e+00 : f32
    %170 = vector.broadcast %cst_78 : f32 to vector<4x256xf32>
    %171 = arith.select %169, %164, %170 : vector<4x256xi1>, vector<4x256xf32>
    %c96 = arith.constant 96 : index
    %c0_79 = arith.constant 0 : index
    %172 = vector.load %arg7[%c96, %c0_79] : memref<128x256xf32, #tpu.memory_space<vmem>>, vector<4x256xf32>
    tpu.vector_store %arg7[%c96, %c0_79], %171 {strides = array<i32>} : memref<128x256xf32, #tpu.memory_space<vmem>>, vector<4x256xf32>,
    %c208_i32_80 = arith.constant 208 : i32
    %173 = tpu.dynamic_rotate %1 by %c208_i32_80 dim 1 : vector<4x256xf32>, i32 -> vector<4x256xf32>
    %c208_i32_81 = arith.constant 208 : i32
    %174 = vector.broadcast %c208_i32_81 : i32 to vector<4x256xi32>
    %175 = arith.cmpi slt, %2, %174 : vector<4x256xi32>
    %cst_82 = arith.constant 0.000000e+00 : f32
    %176 = vector.broadcast %cst_82 : f32 to vector<4x256xf32>
    %177 = arith.select %175, %173, %176 : vector<4x256xi1>, vector<4x256xf32>
    %c100 = arith.constant 100 : index
    %c0_83 = arith.constant 0 : index
    %178 = vector.load %arg7[%c100, %c0_83] : memref<128x256xf32, #tpu.memory_space<vmem>>, vector<4x256xf32>
    tpu.vector_store %arg7[%c100, %c0_83], %177 {strides = array<i32>} : memref<128x256xf32, #tpu.memory_space<vmem>>, vector<4x256xf32>,
    %c205_i32 = arith.constant 205 : i32
    %179 = tpu.dynamic_rotate %1 by %c205_i32 dim 1 : vector<4x256xf32>, i32 -> vector<4x256xf32>
    %c208_i32_84 = arith.constant 208 : i32
    %180 = vector.broadcast %c208_i32_84 : i32 to vector<4x256xi32>
    %181 = arith.cmpi slt, %2, %180 : vector<4x256xi32>
    %c13_i32_85 = arith.constant 13 : i32
    %182 = vector.broadcast %c13_i32_85 : i32 to vector<4x256xi32>
    %183 = arith.cmpi slt, %4, %182 : vector<4x256xi32>
    %184 = arith.andi %181, %183 : vector<4x256xi1>
    %cst_86 = arith.constant 0.000000e+00 : f32
    %185 = vector.broadcast %cst_86 : f32 to vector<4x256xf32>
    %186 = arith.select %184, %179, %185 : vector<4x256xi1>, vector<4x256xf32>
    %c104 = arith.constant 104 : index
    %c0_87 = arith.constant 0 : index
    %187 = vector.load %arg7[%c104, %c0_87] : memref<128x256xf32, #tpu.memory_space<vmem>>, vector<4x256xf32>
    tpu.vector_store %arg7[%c104, %c0_87], %186 {strides = array<i32>} : memref<128x256xf32, #tpu.memory_space<vmem>>, vector<4x256xf32>,
    %cst_88 = arith.constant 0.000000e+00 : f32
    %188 = vector.broadcast %cst_88 : f32 to vector<20x256xf32>
    %c108 = arith.constant 108 : index
    %c0_89 = arith.constant 0 : index
    %189 = vector.load %arg7[%c108, %c0_89] : memref<128x256xf32, #tpu.memory_space<vmem>>, vector<20x256xf32>
    tpu.vector_store %arg7[%c108, %c0_89], %188 {strides = array<i32>} : memref<128x256xf32, #tpu.memory_space<vmem>>, vector<20x256xf32>,
    %c0_90 = arith.constant 0 : index
    %c0_91 = arith.constant 0 : index
    %190 = vector.load %arg2[%c0_90, %c0_91] : memref<8x128xf32, #tpu.memory_space<vmem>>, vector<8x128xf32>
    %c0_92 = arith.constant 0 : index
    %c0_93 = arith.constant 0 : index
    %191 = vector.load %arg7[%c0_92, %c0_93] : memref<128x256xf32, #tpu.memory_space<vmem>>, vector<128x256xf32>
    %cst_94 = arith.constant dense<0.000000e+00> : vector<8x256xf32>
    %192 = tpu.matmul %190, %191, %cst_94 {dimension_numbers = #tpu.dot_dimension_numbers<[1], [0], [0], [1], [0, 0, 1, 1], [], []>} : vector<8x128xf32>, vector<128x256xf32>, vector<8x256xf32> -> vector<8x256xf32>
    %c0_95 = arith.constant 0 : index
    %c0_96 = arith.constant 0 : index
    %193 = vector.load %arg3[%c0_95, %c0_96] : memref<8x1xf32, #tpu.memory_space<vmem>>, vector<8x1xf32>
    %194 = vector.broadcast %193 : vector<8x1xf32> to vector<8x256xf32>
    %195 = arith.addf %192, %194 : vector<8x256xf32>
    %cst_97 = arith.constant 0.000000e+00 : f32
    %196 = vector.broadcast %cst_97 : f32 to vector<8x256xf32>
    %197 = arith.maximumf %195, %196 : vector<8x256xf32>
    %c0_98 = arith.constant 0 : index
    %c0_99 = arith.constant 0 : index
    %198 = vector.load %arg4[%c0_98, %c0_99] : memref<4x8xf32, #tpu.memory_space<vmem>>, vector<4x8xf32>
    %cst_100 = arith.constant dense<0.000000e+00> : vector<4x256xf32>
    %199 = tpu.matmul %198, %197, %cst_100 {dimension_numbers = #tpu.dot_dimension_numbers<[1], [0], [0], [1], [0, 0, 1, 1], [], []>} : vector<4x8xf32>, vector<8x256xf32>, vector<4x256xf32> -> vector<4x256xf32>
    %c0_101 = arith.constant 0 : index
    %c0_102 = arith.constant 0 : index
    %200 = vector.load %arg5[%c0_101, %c0_102] : memref<4x1xf32, #tpu.memory_space<vmem>>, vector<4x1xf32>
    %201 = vector.broadcast %200 : vector<4x1xf32> to vector<4x256xf32>
    %202 = arith.addf %199, %201 : vector<4x256xf32>
    %203 = arith.addf %1, %202 : vector<4x256xf32>
    %c0_103 = arith.constant 0 : index
    %c0_104 = arith.constant 0 : index
    %c0_105 = arith.constant 0 : index
    %204 = vector.load %arg6[%c0_103, %c0_104, %c0_105] : memref<1x4x256xf32, #tpu.memory_space<vmem>>, vector<1x4x256xf32>
    %205 = vector.shape_cast %204 : vector<1x4x256xf32> to vector<4x256xf32>
    %206 = vector.shape_cast %203 : vector<4x256xf32> to vector<1x4x256xf32>
    tpu.vector_store %arg6[%c0_103, %c0_104, %c0_105], %206 {strides = array<i32>} : memref<1x4x256xf32, #tpu.memory_space<vmem>>, vector<1x4x256xf32>,
    return
  }
  func.func @transform_0(%arg0: i32) -> (i32, i32, i32) {
    %c0_i32 = arith.constant 0 : i32
    %c0_i32_0 = arith.constant 0 : i32
    %c0_i32_1 = arith.constant 0 : i32
    return %arg0, %c0_i32, %c0_i32_0 : i32, i32, i32
  }
  func.func @transform_1(%arg0: i32) -> (i32, i32) {
    %c0_i32 = arith.constant 0 : i32
    %c0_i32_0 = arith.constant 0 : i32
    %c0_i32_1 = arith.constant 0 : i32
    return %c0_i32, %c0_i32_0 : i32, i32
  }
  func.func @transform_2(%arg0: i32) -> (i32, i32) {
    %c0_i32 = arith.constant 0 : i32
    %c0_i32_0 = arith.constant 0 : i32
    %c0_i32_1 = arith.constant 0 : i32
    return %c0_i32, %c0_i32_0 : i32, i32
  }
  func.func @transform_3(%arg0: i32) -> (i32, i32) {
    %c0_i32 = arith.constant 0 : i32
    %c0_i32_0 = arith.constant 0 : i32
    %c0_i32_1 = arith.constant 0 : i32
    return %c0_i32, %c0_i32_0 : i32, i32
  }
  func.func @transform_4(%arg0: i32) -> (i32, i32) {
    %c0_i32 = arith.constant 0 : i32
    %c0_i32_0 = arith.constant 0 : i32
    %c0_i32_1 = arith.constant 0 : i32
    return %c0_i32, %c0_i32_0 : i32, i32
  }
  func.func @transform_5(%arg0: i32) -> (i32, i32, i32) {
    %c0_i32 = arith.constant 0 : i32
    %c0_i32_0 = arith.constant 0 : i32
    %c0_i32_1 = arith.constant 0 : i32
    return %arg0, %c0_i32, %c0_i32_0 : i32, i32, i32
  }
}

</mosaic_0001>

<bundles_post_ra>
// kernel: boundary_refine.1
= control target key start
LH: loop header
LB: loop body
LE: loop exit
PB: predicated region body
PF: predicated region fallthrough
CT: control target
= control target key end

     0   :  { %s1003_s18 = smov 0   ;;  %s1278_s0 = inlined_call_operand.vmem [shape: f32[2,4,256], index: 0, kind: input, shape index: {}]   ;;  %s1279_s1 = inlined_call_operand.vmem [shape: f32[8,128], index: 1, kind: input, shape index: {}]   ;;  %s1280_s2 = inlined_call_operand.vmem [shape: f32[8,1], index: 2, kind: input, shape index: {}]   ;;  %s1281_s3 = inlined_call_operand.vmem [shape: f32[4,8], index: 3, kind: input, shape index: {}]   ;;  %s1282_s4 = inlined_call_operand.vmem [shape: f32[4,1], index: 4, kind: input, shape index: {}]   ;;  %s1283_s5 = inlined_call_operand.vmem [shape: f32[2,4,256], index: 5, kind: output, shape index: {}]  }
   0x1 LB: > { %s887_s19 = sadd.s32 4294967295, %s945_s18   ;;  %p891_p0 = scmp.ge.s32.totalorder %s945_s18, 1  ;;  %s945_s18 = sphi %s1003_s18, %s15_s18  }
   0x2   : > { %p187_p1 = scmp.lt.s32.totalorder %s945_s18, 3 }
   0x4   : > { %p188_p2 = pnand %p891_p0, %p187_p1 }
   0x5   : > { %p215_p3 = scmp.lt.s32.totalorder (!%p188_p2), %s887_s19, 1  ;;  %s948_s24 = smov (!%p188_p2), 77  }
   0x6   : > { %191 = sbr.rel (%p188_p2) target bundleno = 638 (0x27e), region = 40  ;;  %s949_s25 = smov (!%p188_p2), 80  }
   0x7   : > { %s950_s26 = smov (!%p188_p2), 125   ;;  %s951_s27 = smov (!%p188_p2), 83  }
   0x8   : > { %s952_s28 = smov (!%p188_p2), 3   ;;  %s953_s29 = smov (!%p188_p2), 45  }
   0x9   : > { %s954_s30 = smov (!%p188_p2), 48   ;;  %s955_s6 = smov (!%p188_p2), 94  }
   0xa   : > { %s956_s7 = smov (!%p188_p2), 51   ;;  %s957_s8 = smov (!%p188_p2), 98  }
   0xb   : > { %v947_v0 = vmov 0.0   ;;  %s1289_s19 = smov (!%p215_p3, %s887_s19), 1  ;;  %s958_s9 = smov 96   ;;  %v226_v4 = vlaneseq  ;;  %v972_v10 = vmov 0   ;;  %v665_v11 = vld [vmem:[%s1280_s2] sm:$0xff] }
   0xc   : > { %671 = vmatprep.subr.mxu0 %v947_v0  ;;  %626 = vst [vmem:[#allocation2 + $0x10] sm:$0xf0] %v947_v0  ;;  %627 = vst [vmem:[#allocation2 + $0x28] sm:$0xf0] %v947_v0  ;;  %735 = vmatprep.mubr.f32.mxu0 %v947_v0  ;;  %s899_s20 = sshll.u32 %s1289_s19, 3  ;;  %s959_s10 = smov 126  }
   0xd   : > { %672 = vmatpush1.msra.mxu0 %v947_v0  ;;  %819 = vmatprep.mubr.f32.mxu1 %v947_v0  ;;  %s219_s23 = scalar_lea.vmem %s1278_s0, %s899_s20  ;;  %v1056_v5 = vand.u32 127, %v226_v4  ;;  %s960_s11 = smov 30  }
   0xe   : > { %673 = vmatprep.subr.mxu0 %v947_v0  ;;  %v1019_v1 = vld [vmem:[%s219_s23] sm:$0xff]  ;;  %s961_s12 = smov 2   ;;  %s962_s13 = smov 34   ;;  %935 = vset.pattern.permute.xlu0 %v972_v10 }
   0xf   : > { %674 = vmatpush1.msra.mxu0 %v947_v0  ;;  %613 = vrot.lane.b32.xlu1 %v1019_v1, %s948_s24  ;;  %300 = vst [vmem:[#allocation2 + $0x50] sm:$0xf] %v1019_v1  ;;  %433 = vst [vmem:[#allocation2 + $0xf0] sm:$0xf0] %v1019_v1  ;;  %v1028_v2 = vcombine.high %v1019_v1, %v1019_v1  ;;  %v430_v3 = vcombine.low %v1019_v1, %v1019_v1  ;;  %v1061_v6 = vadd.s32 128, %v1056_v5  ;;  %s963_s14 = smov 32  }
  0x10   : > { %562 = vst [vmem:[#allocation2 + $0x70] sm:$0xf] %v1019_v1  ;;  %596 = vrot.lane.b32.xlu0 %v1019_v1, %s949_s25  ;;  %s964_s15 = smov 112   ;;  %s965_s16 = smov 111   ;;  %936 = vset.pattern.permute.xlu1 %v972_v10  ;;  %v1111_v12 = vand.u32 15, %v1056_v5  ;;  %vm617_vm7 = vcmp.lt.s32.totalorder %v1056_v5, 77 }
  0x11   : > { %301 = vst [vmem:[#allocation2 + $0x68] sm:$0xf] %v1028_v2  ;;  %563 = vst [vmem:[#allocation2 + $0xc0] sm:$0xf] %v1028_v2  ;;  %v1066_v7 = vand.u32 15, %v1061_v6  ;;  %vm327_vm0 = vcmp.lt.s32.totalorder %v1061_v6, 240 }
  0x12   : > { %432 = vst [vmem:[#allocation2 + $0x60] sm:$0xf0] %v430_v3  ;;  %s966_s17 = smov 127   ;;  %s967_s21 = smov 113   ;;  %vm589_vm6 = vcmp.lt.s32.totalorder %v1061_v6, 208  ;;  %vm537_vm8 = vcmp.lt.s32.totalorder %v1111_v12, 13 }
  0x13   : > { %615 = vrot.lane.b32.xlu1 %v1028_v2, %s948_s24  ;;  %vm276_vm1 = vcmp.lt.s32.totalorder %v1066_v7, 15  ;;  %vm244_vm3 = vcmp.ge.s32.totalorder %v1066_v7, 1  ;;  %s968_s22 = smov 1   ;;  %s969_s23 = smov 15   ;;  %vm538_vm5 = vcmp.lt.s32.totalorder %v1066_v7, 13  ;;  %vm568_vm10 = vcmp.lt.s32.totalorder %v1056_v5, 125 }
  0x14   : > { %564 = vrot.lane.b32.xlu0 %v1019_v1, %s950_s26  ;;  %vm1074_vm2 = vmand %vm327_vm0, %vm276_vm1  ;;  %s970_s24 = smov 16   ;;  %vm600_vm11 = vcmp.lt.s32.totalorder %v1056_v5, 80  ;;  %vm506_vm12 = vcmp.ge.s32.totalorder %v1066_v7, 3  ;;  %vm585_vm13 = vcmp.lt.s32.totalorder %v1056_v5, 83  ;;  %vm505_vm14 = vcmp.ge.s32.totalorder %v1111_v12, 3 }
  0x15   : > { %vm1087_vm4 = vmand %vm327_vm0, %vm244_vm3 }
  0x16   : > { %vm621_vm9 = vmand %vm589_vm6, %vm538_vm5 }
  0x17   : > { %566 = vrot.lane.b32.xlu1 %v1028_v2, %s950_s26  ;;  %vm591_vm15 = vmand %vm589_vm6, %vm506_vm12 }
  0x18   : > { %598 = vrot.lane.b32.xlu0 %v1028_v2, %s949_s25  ;;  %s971_s25 = smov 17  }
  0x1b   : > { %583 = vrot.lane.b32.xlu1 %v1028_v2, %s951_s27 }
  0x1c   : > { %581 = vrot.lane.b32.xlu0 %v1019_v1, %s951_s27 }
  0x1f   : > { %547 = vrot.lane.b32.xlu1 %v1028_v2, %s952_s28 }
  0x20   : > { %545 = vrot.lane.b32.xlu0 %v1019_v1, %s952_s28 }
  0x23   : > { %532 = vrot.lane.b32.xlu1 %v1028_v2, %s953_s29 }
  0x24   : > { %530 = vrot.lane.b32.xlu0 %v1019_v1, %s953_s29 }
  0x27   : > { %515 = vrot.lane.b32.xlu1 %v1028_v2, %s954_s30 }
  0x28   : > { %513 = vrot.lane.b32.xlu0 %v1019_v1, %s954_s30 }
  0x2b   : > { %479 = vrot.lane.b32.xlu1 %v1028_v2, %s955_s6 }
  0x2c   : > { %477 = vrot.lane.b32.xlu0 %v1019_v1, %s955_s6 }
  0x2f   : > { %498 = vrot.lane.b32.xlu1 %v1028_v2, %s956_s7 }
  0x30   : > { %496 = vrot.lane.b32.xlu0 %v1019_v1, %s956_s7 }
  0x33   : > { %447 = vrot.lane.b32.xlu1 %v1028_v2, %s957_s8 }
  0x34   : > { %445 = vrot.lane.b32.xlu0 %v1019_v1, %s957_s8 }
  0x37   : > { %468 = vrot.lane.b32.xlu1 %v1028_v2, %s958_s9 }
  0x38   : > { %466 = vrot.lane.b32.xlu0 %v1019_v1, %s958_s9 }
  0x3b   : > { %436 = vrot.lane.b32.xlu1 %v1028_v2, %s959_s10 }
  0x3c   : > { %434 = vrot.lane.b32.xlu0 %v1019_v1, %s959_s10 }
  0x3f   : > { %400 = vrot.lane.b32.xlu1 %v1028_v2, %s960_s11 }
  0x40   : > { %398 = vrot.lane.b32.xlu0 %v1019_v1, %s960_s11  ;;  %s224_s11 = scalar_lea.vmem %s1283_s5, %s899_s20 }
  0x43   : > { %421 = vrot.lane.b32.xlu1 %v1028_v2, %s961_s12 }
  0x44   : > { %419 = vrot.lane.b32.xlu0 %v1019_v1, %s961_s12 }
  0x47   : > { %366 = vrot.lane.b32.xlu1 %v1028_v2, %s962_s13 }
  0x48   : > { %364 = vrot.lane.b32.xlu0 %v1019_v1, %s962_s13 }
  0x4b   : > { %389 = vrot.lane.b32.xlu1 %v1028_v2, %s963_s14 }
  0x4c   : > { %387 = vrot.lane.b32.xlu0 %v1019_v1, %s963_s14 }
  0x4f   : > { %336 = vrot.lane.b32.xlu1 %v1028_v2, %s964_s15 }
  0x50   : > { %334 = vrot.lane.b32.xlu0 %v1019_v1, %s964_s15 }
  0x53   : > { %353 = vrot.lane.b32.xlu1 %v1028_v2, %s965_s16 }
  0x54   : > { %351 = vrot.lane.b32.xlu0 %v1019_v1, %s965_s16 }
  0x57   : > { %304 = vrot.lane.b32.xlu1 %v1028_v2, %s966_s17 }
  0x58   : > { %302 = vrot.lane.b32.xlu0 %v1019_v1, %s966_s17 }
  0x5b   : > { %321 = vrot.lane.b32.xlu1 %v1028_v2, %s967_s21 }
  0x5c   : > { %319 = vrot.lane.b32.xlu0 %v1019_v1, %s967_s21 }
  0x5f   : > { %285 = vrot.lane.b32.xlu1 %v1028_v2, %s968_s22 }
  0x60   : > { %283 = vrot.lane.b32.xlu0 %v1019_v1, %s968_s22 }
  0x63   : > { %270 = vrot.lane.b32.xlu1 %v1028_v2, %s969_s23 }
  0x64   : > { %268 = vrot.lane.b32.xlu0 %v1019_v1, %s969_s23 }
  0x67   : > { %253 = vrot.lane.b32.xlu1 %v1028_v2, %s970_s24 }
  0x68   : > { %251 = vrot.lane.b32.xlu0 %v1019_v1, %s970_s24 }
  0x6b   : > { %236 = vrot.lane.b32.xlu1 %v1028_v2, %s971_s25 }
  0x6c   : > { %234 = vrot.lane.b32.xlu0 %v1019_v1, %s971_s25 }
  0x70   : > { %668 = vperm.xlu0 %935, %v665_v11  }
  0x81   : > { %v614_v13 = vpop.permute.xlu1 %613 }
  0x82   : > { %v597_v14 = vpop.permute.xlu0 %596 }
  0x85   : > { %v616_v16 = vpop.permute.xlu1 %615 }
  0x86   : > { %v565_v15 = vpop.permute.xlu0 %564  ;;  %v618_v17 = vsel %vm617_vm7, %v614_v13, %v616_v16  ;;  %v619_v18 = vsel %vm617_vm7, %v616_v16, %v614_v13  ;;  %vm503_vm7 = vcmp.ge.s32.totalorder %v1056_v5, 48 }
  0x87   : > { %v622_v19 = vsel %vm537_vm8, %v618_v17, 0.0  ;;  %v623_v20 = vsel %vm621_vm9, %v619_v18, 0.0  ;;  %vm534_vm9 = vcmp.lt.s32.totalorder %v1056_v5, 45 }
  0x88   : > { %624 = vst [vmem:[#allocation2 + $0x10] sm:$0xf] %v622_v19  ;;  %625 = vst [vmem:[#allocation2 + $0x28] sm:$0xf] %v623_v20 }
  0x89   : > { %v567_v21 = vpop.permute.xlu1 %566 }
  0x8a   : > { %v599_v22 = vpop.permute.xlu0 %598  ;;  %v569_v23 = vsel %vm568_vm10, %v565_v15, %v567_v21  ;;  %v570_v24 = vsel %vm568_vm10, %v567_v21, %v565_v15  ;;  %vm539_vm10 = vmand %vm503_vm7, %vm537_vm8 }
  0x8b   : > { %v601_v25 = vsel %vm600_vm11, %v597_v14, %v599_v22  ;;  %v602_v26 = vsel %vm600_vm11, %v599_v22, %v597_v14  ;;  %v571_v27 = vsel %vm537_vm8, %v569_v23, 0.0  ;;  %v572_v28 = vsel %vm538_vm5, %v570_v24, 0.0 }
  0x8c   : > { %v604_v29 = vsel %vm589_vm6, %v602_v26, 0.0  ;;  %v607_v30 = vrot.slane %v601_v25, 4  ;;  %v575_v31 = vrot.slane %v571_v27, 4  ;;  %v576_v32 = vrot.slane %v572_v28, 4 }
  0x8d   : > { %v608_v33 = vrot.slane %v604_v29, 4  ;;  %v584_v34 = vpop.permute.xlu1 %583  ;;  %vm549_vm6 = vcmp.lt.s32.totalorder %v1056_v5, 3  ;;  %vm517_vm11 = vcmp.lt.s32.totalorder %v1056_v5, 48  ;;  %vm406_vm8 = vcmp.lt.s32.totalorder %v1066_v7, 14 }
  0x8e   : > { %611 = vst [vmem:[#allocation2 + $0xa8] sm:$0xf0] %v607_v30  ;;  %v582_v35 = vpop.permute.xlu0 %581  ;;  %579 = vst [vmem:[#allocation2 + $0x70] sm:$0xf0] %v575_v31 }
  0x8f   : > { %580 = vst [vmem:[#allocation2 + $0xc0] sm:$0xf0] %v576_v32  ;;  %612 = vst [vmem:[#allocation2 + $0xd0] sm:$0xf0] %v608_v33  ;;  %v586_v36 = vsel %vm585_vm13, %v582_v35, %v584_v34  ;;  %v587_v37 = vsel %vm585_vm13, %v584_v34, %v582_v35  ;;  %v660_v40 = vld [vmem:[#allocation2 + $0x28] sm:$0xff]  ;;  %v659_v41 = vld [vmem:[#allocation2 + $0x10] sm:$0xff] }
  0x90   : > { %v592_v38 = vsel %vm505_vm14, %v586_v36, 0.0  ;;  %v593_v39 = vsel %vm591_vm15, %v587_v37, 0.0  ;;  %675 = vmatprep.subr.mxu0 %v660_v40  ;;  %vm453_vm13 = vcmp.lt.s32.totalorder %v1061_v6, 224  ;;  %vm405_vm15 = vcmp.lt.s32.totalorder %v1111_v12, 14 }
  0x91   : > { %594 = vst [vmem:[#allocation2 + $0xa8] sm:$0xf] %v592_v38  ;;  %595 = vst [vmem:[#allocation2 + $0xd0] sm:$0xf] %v593_v39  ;;  %676 = vmatpush1.msra.mxu0 %v659_v41  ;;  %v548_v42 = vpop.permute.xlu1 %547 }
  0x92   : > { %v546_v43 = vpop.permute.xlu0 %545 }
  0x93   : > { %v550_v44 = vsel %vm549_vm6, %v546_v43, %v548_v42  ;;  %v551_v45 = vsel %vm549_vm6, %v548_v42, %v546_v43  ;;  %vm485_vm6 = vmand %vm453_vm13, %vm406_vm8 }
  0x94   : > { %v552_v46 = vsel %vm505_vm14, %v551_v45, 0.0  ;;  %v553_v47 = vsel %vm506_vm12, %v550_v44, 0.0 }
  0x95   : > { %v556_v48 = vrot.slane %v552_v46, 4  ;;  %v557_v49 = vrot.slane %v553_v47, 4  ;;  %v533_v50 = vpop.permute.xlu1 %532  ;;  %v655_v63 = vld [vmem:[#allocation2 + $0x70] sm:$0xff] }
  0x96   : > { %v531_v51 = vpop.permute.xlu0 %530  ;;  %v656_v60 = vld [vmem:[#allocation2 + $0xc0] sm:$0xff] }
  0x97   : > { %560 = vst [vmem:[#allocation2 + $0xe0] sm:$0xf0] %v556_v48  ;;  %561 = vst [vmem:[#allocation2 + $0x90] sm:$0xf0] %v557_v49  ;;  %v535_v52 = vsel %vm534_vm9, %v531_v51, %v533_v50  ;;  %v536_v53 = vsel %vm534_vm9, %v533_v50, %v531_v51  ;;  %vm500_vm9 = vcmp.lt.s32.totalorder %v1056_v5, 51 }
  0x98   : > { %v541_v54 = vsel %vm539_vm10, %v536_v53, 0.0  ;;  %v542_v55 = vsel %vm538_vm5, %v535_v52, 0.0  ;;  %v658_v56 = vld [vmem:[#allocation2 + $0xd0] sm:$0xff]  ;;  %v657_v57 = vld [vmem:[#allocation2 + $0xa8] sm:$0xff]  ;;  %vm481_vm5 = vcmp.lt.s32.totalorder %v1056_v5, 94  ;;  %vm507_vm10 = vmand %vm503_vm7, %vm505_vm14 }
  0x99   : > { %543 = vst [vmem:[#allocation2 + $0xe0] sm:$0xf] %v541_v54  ;;  %544 = vst [vmem:[#allocation2 + $0x90] sm:$0xf] %v542_v55  ;;  %677 = vmatprep.subr.mxu0 %v658_v56  ;;  %v516_v58 = vpop.permute.xlu1 %515 }
  0x9a   : > { %678 = vmatpush1.msra.mxu0 %v657_v57  ;;  %v514_v59 = vpop.permute.xlu0 %513 }
  0x9b   : > { %v518_v61 = vsel %vm517_vm11, %v514_v59, %v516_v58  ;;  %v519_v62 = vsel %vm517_vm11, %v516_v58, %v514_v59  ;;  %679 = vmatprep.subr.mxu0 %v656_v60  ;;  %vm374_vm11 = vcmp.ge.s32.totalorder %v1066_v7, 2  ;;  %v745_v7 = vld [vmem:[%s1282_s4] sm:$0xf] }
  0x9c   : > { %v520_v0 = vsel %vm503_vm7, %v519_v62, 0.0  ;;  %v525_v2 = vrot.slane %v518_v61, 4  ;;  %680 = vmatpush1.msra.mxu0 %v655_v63  ;;  %vm455_vm14 = vmand %vm453_vm13, %vm374_vm11  ;;  %vm438_vm7 = vcmp.lt.s32.totalorder %v1056_v5, 126  ;;  %748 = vperm.xlu1 %936, %v745_v7  }
  0x9d   : > { %v524_v3 = vrot.slane %v520_v0, 4  ;;  %v480_v4 = vpop.permute.xlu1 %479 }
  0x9e   : > { %529 = vst [vmem:[#allocation2 + $0xc8] sm:$0xf0] %v525_v2  ;;  %v478_v10 = vpop.permute.xlu0 %477 }
  0x9f   : > { %528 = vst [vmem:[#allocation2 + $0x40] sm:$0xf0] %v524_v3  ;;  %v482_v11 = vsel %vm481_vm5, %v478_v10, %v480_v4  ;;  %v483_v13 = vsel %vm481_vm5, %v480_v4, %v478_v10  ;;  %vm449_vm5 = vcmp.lt.s32.totalorder %v1056_v5, 98 }
  0xa0   : > { %v486_v14 = vsel %vm405_vm15, %v482_v11, 0.0  ;;  %v487_v15 = vsel %vm485_vm6, %v483_v13, 0.0  ;;  %v654_v16 = vld [vmem:[#allocation2 + $0x90] sm:$0xff]  ;;  %v653_v17 = vld [vmem:[#allocation2 + $0xe0] sm:$0xff]  ;;  %vm373_vm6 = vcmp.ge.s32.totalorder %v1111_v12, 2 }
  0xa1   : > { %v490_v18 = vrot.slane %v486_v14, 4  ;;  %v491_v19 = vrot.slane %v487_v15, 4  ;;  %681 = vmatprep.subr.mxu0 %v654_v16  ;;  %v499_v20 = vpop.permute.xlu1 %498 }
  0xa2   : > { %v497_v21 = vpop.permute.xlu0 %496  ;;  %682 = vmatpush1.msra.mxu0 %v653_v17 }
  0xa3   : > { %494 = vst [vmem:[#allocation2 + $0x38] sm:$0xf0] %v490_v18  ;;  %495 = vst [vmem:[#allocation2 + $0x58] sm:$0xf0] %v491_v19  ;;  %v501_v22 = vsel %vm500_vm9, %v497_v21, %v499_v20  ;;  %v502_v23 = vsel %vm500_vm9, %v499_v20, %v497_v21  ;;  %vm371_vm9 = vcmp.ge.s32.totalorder %v1056_v5, 32 }
  0xa4   : > { %v509_v24 = vsel %vm507_vm10, %v502_v23, 0.0  ;;  %v510_v25 = vsel %vm506_vm12, %v501_v22, 0.0  ;;  %vm470_vm12 = vcmp.lt.s32.totalorder %v1056_v5, 96  ;;  %vm407_vm10 = vmand %vm371_vm9, %vm405_vm15 }
  0xa5   : > { %511 = vst [vmem:[#allocation2 + $0x40] sm:$0xf] %v509_v24  ;;  %512 = vst [vmem:[#allocation2 + $0xc8] sm:$0xf] %v510_v25  ;;  %v448_v26 = vpop.permute.xlu1 %447 }
  0xa6   : > { %v446_v27 = vpop.permute.xlu0 %445 }
  0xa7   : > { %v450_v28 = vsel %vm449_vm5, %v446_v27, %v448_v26  ;;  %v451_v29 = vsel %vm449_vm5, %v448_v26, %v446_v27  ;;  %vm423_vm5 = vcmp.lt.s32.totalorder %v1056_v5, 2 }
  0xa8   : > { %v456_v30 = vsel %vm373_vm6, %v450_v28, 0.0  ;;  %v457_v31 = vsel %vm455_vm14, %v451_v29, 0.0  ;;  %vm391_vm14 = vcmp.lt.s32.totalorder %v1056_v5, 32 }
  0xa9   : > { %v460_v32 = vrot.slane %v456_v30, 4  ;;  %v461_v33 = vrot.slane %v457_v31, 4  ;;  %v469_v34 = vpop.permute.xlu1 %468 }
  0xaa   : > { %v467_v35 = vpop.permute.xlu0 %466 }
  0xab   : > { %464 = vst [vmem:[#allocation2 + $0x8] sm:$0xf0] %v460_v32  ;;  %465 = vst [vmem:[#allocation2 + $0x78] sm:$0xf0] %v461_v33  ;;  %v471_v36 = vsel %vm470_vm12, %v467_v35, %v469_v34  ;;  %v472_v37 = vsel %vm470_vm12, %v469_v34, %v467_v35  ;;  %vm275_vm12 = vcmp.lt.s32.totalorder %v1111_v12, 15 }
  0xac   : > { %v474_v38 = vsel %vm453_vm13, %v472_v37, 0.0  ;;  %475 = vst [vmem:[#allocation2 + $0x38] sm:$0xf] %v471_v36  ;;  %v652_v39 = vld [vmem:[#allocation2 + $0xc8] sm:$0xff]  ;;  %v651_v40 = vld [vmem:[#allocation2 + $0x40] sm:$0xff]  ;;  %vm402_vm13 = vcmp.lt.s32.totalorder %v1056_v5, 30 }
  0xad   : > { %476 = vst [vmem:[#allocation2 + $0x58] sm:$0xf] %v474_v38  ;;  %683 = vmatprep.subr.mxu0 %v652_v39  ;;  %v437_v41 = vpop.permute.xlu1 %436 }
  0xae   : > { %v435_v42 = vpop.permute.xlu0 %434  ;;  %684 = vmatpush1.msra.mxu0 %v651_v40 }
  0xaf   : > { %v439_v43 = vsel %vm438_vm7, %v435_v42, %v437_v41  ;;  %v440_v44 = vsel %vm438_vm7, %v437_v41, %v435_v42  ;;  %vm323_vm7 = vcmp.lt.s32.totalorder %v1056_v5, 113 }
  0xb0   : > { %v441_v45 = vsel %vm405_vm15, %v439_v43, 0.0  ;;  %v442_v46 = vsel %vm406_vm8, %v440_v44, 0.0  ;;  %vm375_vm15 = vmand %vm371_vm9, %vm373_vm6 }
  0xb1   : > { %443 = vst [vmem:[#allocation2 + $0x8] sm:$0xf] %v441_v45  ;;  %444 = vst [vmem:[#allocation2 + $0x78] sm:$0xf] %v442_v46  ;;  %v401_v47 = vpop.permute.xlu1 %400 }
  0xb2   : > { %v399_v48 = vpop.permute.xlu0 %398 }
  0xb3   : > { %v403_v49 = vsel %vm402_vm13, %v399_v48, %v401_v47  ;;  %v404_v50 = vsel %vm402_vm13, %v401_v47, %v399_v48  ;;  %v649_v56 = vld [vmem:[#allocation2 + $0x38] sm:$0xff]  ;;  %vm241_vm13 = vcmp.ge.s32.totalorder %v1056_v5, 16 }
  0xb4   : > { %v409_v51 = vsel %vm407_vm10, %v404_v50, 0.0  ;;  %v410_v52 = vsel %vm406_vm8, %v403_v49, 0.0  ;;  %v650_v53 = vld [vmem:[#allocation2 + $0x58] sm:$0xff]  ;;  %vm368_vm8 = vcmp.lt.s32.totalorder %v1056_v5, 34  ;;  %vm277_vm10 = vmand %vm241_vm13, %vm275_vm12 }
  0xb5   : > { %v413_v54 = vrot.slane %v409_v51, 4  ;;  %v414_v55 = vrot.slane %v410_v52, 4  ;;  %685 = vmatprep.subr.mxu0 %v650_v53  ;;  %v422_v57 = vpop.permute.xlu1 %421 }
  0xb6   : > { %v420_v58 = vpop.permute.xlu0 %419  ;;  %686 = vmatpush1.msra.mxu0 %v649_v56 }
  0xb7   : > { %417 = vst [vmem:[#allocation2 + $0xe8] sm:$0xf0] %v413_v54  ;;  %418 = vst [vmem:[#allocation2 + $0xb8] sm:$0xf0] %v414_v55  ;;  %v424_v59 = vsel %vm423_vm5, %v420_v58, %v422_v57  ;;  %v425_v60 = vsel %vm423_vm5, %v422_v57, %v420_v58  ;;  %vm255_vm5 = vcmp.lt.s32.totalorder %v1056_v5, 16 }
  0xb8   : > { %v426_v61 = vsel %vm373_vm6, %v425_v60, 0.0  ;;  %v427_v62 = vsel %vm374_vm11, %v424_v59, 0.0  ;;  %v648_v63 = vld [vmem:[#allocation2 + $0x78] sm:$0xff]  ;;  %v647_v0 = vld [vmem:[#allocation2 + $0x8] sm:$0xff]  ;;  %vm338_vm6 = vcmp.lt.s32.totalorder %v1056_v5, 112 }
  0xb9   : > { %428 = vst [vmem:[#allocation2 + $0x60] sm:$0xf] %v426_v61  ;;  %429 = vst [vmem:[#allocation2 + $0xf0] sm:$0xf] %v427_v62  ;;  %687 = vmatprep.subr.mxu0 %v648_v63  ;;  %v367_v2 = vpop.permute.xlu1 %366 }
  0xba   : > { %v365_v3 = vpop.permute.xlu0 %364  ;;  %688 = vmatpush1.msra.mxu0 %v647_v0 }
  0xbb   : > { %v369_v4 = vsel %vm368_vm8, %v365_v3, %v367_v2  ;;  %v370_v10 = vsel %vm368_vm8, %v367_v2, %v365_v3 }
  0xbc   : > { %v377_v11 = vsel %vm375_vm15, %v370_v10, 0.0  ;;  %v378_v13 = vsel %vm374_vm11, %v369_v4, 0.0  ;;  %vm355_vm11 = vcmp.lt.s32.totalorder %v1056_v5, 111 }
  0xbd   : > { %v381_v14 = vrot.slane %v377_v11, 4  ;;  %v382_v15 = vrot.slane %v378_v13, 4  ;;  %v390_v16 = vpop.permute.xlu1 %389 }
  0xbe   : > { %v388_v17 = vpop.permute.xlu0 %387 }
  0xbf   : > { %385 = vst [vmem:[#allocation2 + $0x80] sm:$0xf0] %v381_v14  ;;  %386 = vst [vmem:[#allocation2 + $0x88] sm:$0xf0] %v382_v15  ;;  %v392_v18 = vsel %vm391_vm14, %v388_v17, %v390_v16  ;;  %v393_v19 = vsel %vm391_vm14, %v390_v16, %v388_v17 }
  0xc0   : > { %v394_v20 = vsel %vm371_vm9, %v393_v19, 0.0  ;;  %397 = vst [vmem:[#allocation2 + $0xb8] sm:$0xf] %v392_v18  ;;  %v646_v21 = vld [vmem:[#allocation2 + $0xf0] sm:$0xff]  ;;  %v645_v22 = vld [vmem:[#allocation2 + $0x60] sm:$0xff]  ;;  %vm287_vm9 = vcmp.lt.s32.totalorder %v1056_v5, 1 }
  0xc1   : > { %396 = vst [vmem:[#allocation2 + $0xe8] sm:$0xf] %v394_v20  ;;  %689 = vmatprep.subr.mxu0 %v646_v21  ;;  %v337_v23 = vpop.permute.xlu1 %336 }
  0xc2   : > { %v335_v24 = vpop.permute.xlu0 %334  ;;  %690 = vmatpush1.msra.mxu0 %v645_v22 }
  0xc3   : > { %v339_v25 = vsel %vm338_vm6, %v335_v24, %v337_v23  ;;  %v340_v26 = vsel %vm338_vm6, %v337_v23, %v335_v24 }
  0xc4   : > { %v342_v27 = vsel %vm327_vm0, %v340_v26, 0.0  ;;  %v345_v28 = vrot.slane %v339_v25, 4  ;;  %vm306_vm0 = vcmp.lt.s32.totalorder %v1056_v5, 127 }
  0xc5   : > { %v346_v29 = vrot.slane %v342_v27, 4  ;;  %v354_v30 = vpop.permute.xlu1 %353 }
  0xc6   : > { %349 = vst [vmem:[#allocation2 + $0x30] sm:$0xf0] %v345_v28  ;;  %v352_v31 = vpop.permute.xlu0 %351 }
  0xc7   : > { %350 = vst [vmem:[#allocation2 + $0x48] sm:$0xf0] %v346_v29  ;;  %v356_v32 = vsel %vm355_vm11, %v352_v31, %v354_v30  ;;  %v357_v33 = vsel %vm355_vm11, %v354_v30, %v352_v31  ;;  %v644_v34 = vld [vmem:[#allocation2 + $0xb8] sm:$0xff] }
  0xc8   : > { %v360_v35 = vsel %vm275_vm12, %v356_v32, 0.0  ;;  %v361_v6 = vsel %vm1074_vm2, %v357_v33, 0.0  ;;  %691 = vmatprep.subr.mxu0 %v644_v34  ;;  %v643_v36 = vld [vmem:[#allocation2 + $0xe8] sm:$0xff]  ;;  %vm243_vm2 = vcmp.ge.s32.totalorder %v1111_v12, 1 }
  0xc9   : > { %362 = vst [vmem:[#allocation2 + $0x80] sm:$0xf] %v360_v35  ;;  %363 = vst [vmem:[#allocation2 + $0x88] sm:$0xf] %v361_v6  ;;  %692 = vmatpush1.msra.mxu0 %v643_v36  ;;  %v305_v37 = vpop.permute.xlu1 %304  ;;  %v744_v35 = vld [vmem:[%s1281_s3] sm:$0xf] }
  0xca   : > { %v303_v38 = vpop.permute.xlu0 %302  ;;  %vm245_vm8 = vmand %vm241_vm13, %vm243_vm2 }
  0xcb   : > { %v307_v39 = vsel %vm306_vm0, %v303_v38, %v305_v37  ;;  %v308_v40 = vsel %vm306_vm0, %v305_v37, %v303_v38 }
  0xcc   : > { %v309_v41 = vsel %vm275_vm12, %v307_v39, 0.0  ;;  %v310_v42 = vsel %vm276_vm1, %v308_v40, 0.0 }
  0xcd   : > { %v313_v8 = vrot.slane %v309_v41, 4  ;;  %v314_v43 = vrot.slane %v310_v42, 4  ;;  %v322_v44 = vpop.permute.xlu1 %321 }
  0xce   : > { %v320_v45 = vpop.permute.xlu0 %319 }
  0xcf   : > { %317 = vst [vmem:[#allocation2 + $0x50] sm:$0xf0] %v313_v8  ;;  %318 = vst [vmem:[#allocation2 + $0x68] sm:$0xf0] %v314_v43  ;;  %v324_v46 = vsel %vm323_vm7, %v320_v45, %v322_v44  ;;  %v325_v47 = vsel %vm323_vm7, %v322_v44, %v320_v45 }
  0xd0   : > { %v330_v48 = vsel %vm243_vm2, %v324_v46, 0.0  ;;  %v331_v49 = vsel %vm1087_vm4, %v325_v47, 0.0  ;;  %v642_v50 = vld [vmem:[#allocation2 + $0x88] sm:$0xff]  ;;  %v641_v51 = vld [vmem:[#allocation2 + $0x80] sm:$0xff]  ;;  %vm272_vm4 = vcmp.lt.s32.totalorder %v1056_v5, 15 }
  0xd1   : > { %332 = vst [vmem:[#allocation2 + $0x30] sm:$0xf] %v330_v48  ;;  %333 = vst [vmem:[#allocation2 + $0x48] sm:$0xf] %v331_v49  ;;  %693 = vmatprep.subr.mxu0 %v642_v50  ;;  %v286_v52 = vpop.permute.xlu1 %285 }
  0xd2   : > { %v284_v53 = vpop.permute.xlu0 %283  ;;  %694 = vmatpush1.msra.mxu0 %v641_v51 }
  0xd3   : > { %v288_v54 = vsel %vm287_vm9, %v284_v53, %v286_v52  ;;  %v289_v55 = vsel %vm287_vm9, %v286_v52, %v284_v53 }
  0xd4   : > { %v290_v56 = vsel %vm243_vm2, %v289_v55, 0.0  ;;  %v291_v9 = vsel %vm244_vm3, %v288_v54, 0.0 }
  0xd5   : > { %v294_v57 = vrot.slane %v290_v56, 4  ;;  %v295_v58 = vrot.slane %v291_v9, 4  ;;  %v271_v59 = vpop.permute.xlu1 %270 }
  0xd6   : > { %v269_v60 = vpop.permute.xlu0 %268  ;;  %v638_v11 = vld [vmem:[#allocation2 + $0x68] sm:$0xff]  ;;  %v637_v15 = vld [vmem:[#allocation2 + $0x50] sm:$0xff] }
  0xd7   : > { %298 = vst [vmem:[#allocation2 + $0xd8] sm:$0xf0] %v294_v57  ;;  %299 = vst [vmem:[#allocation2 + $0x18] sm:$0xf0] %v295_v58  ;;  %v273_v61 = vsel %vm272_vm4, %v269_v60, %v271_v59  ;;  %v274_v62 = vsel %vm272_vm4, %v271_v59, %v269_v60 }
  0xd8   : > { %v279_v63 = vsel %vm277_vm10, %v274_v62, 0.0  ;;  %v280_v0 = vsel %vm276_vm1, %v273_v61, 0.0  ;;  %v640_v2 = vld [vmem:[#allocation2 + $0x48] sm:$0xff]  ;;  %v639_v3 = vld [vmem:[#allocation2 + $0x30] sm:$0xff]  ;;  %vm238_vm1 = vcmp.lt.s32.totalorder %v1056_v5, 17  ;;  %v632_v5 = vld [vmem:[%s1279_s1] sm:$0xff] }
  0xd9   : > { %281 = vst [vmem:[#allocation2 + $0xd8] sm:$0xf] %v279_v63  ;;  %282 = vst [vmem:[#allocation2 + $0x18] sm:$0xf] %v280_v0  ;;  %695 = vmatprep.subr.mxu0 %v640_v2  ;;  %v254_v4 = vpop.permute.xlu1 %253 }
  0xda   : > { %v252_v10 = vpop.permute.xlu0 %251  ;;  %696 = vmatpush1.msra.mxu0 %v639_v3 }
  0xdb   : > { %v256_v13 = vsel %vm255_vm5, %v252_v10, %v254_v4  ;;  %v257_v14 = vsel %vm255_vm5, %v254_v4, %v252_v10  ;;  %697 = vmatprep.subr.mxu0 %v638_v11 }
  0xdc   : > { %v258_v16 = vsel %vm241_vm13, %v257_v14, 0.0  ;;  %v263_v17 = vrot.slane %v256_v13, 4  ;;  %698 = vmatpush1.msra.mxu0 %v637_v15 }
  0xdd   : > { %v262_v18 = vrot.slane %v258_v16, 4  ;;  %v237_v19 = vpop.permute.xlu1 %236 }
  0xde   : > { %267 = vst [vmem:[#allocation2] sm:$0xf0] %v263_v17  ;;  %v235_v20 = vpop.permute.xlu0 %234 }
  0xdf   : > { %266 = vst [vmem:[#allocation2 + $0xb0] sm:$0xf0] %v262_v18  ;;  %v239_v21 = vsel %vm238_vm1, %v235_v20, %v237_v19  ;;  %v240_v22 = vsel %vm238_vm1, %v237_v19, %v235_v20 }
  0xe0   : > { %v247_v23 = vsel %vm245_vm8, %v240_v22, 0.0  ;;  %v248_v24 = vsel %vm244_vm3, %v239_v21, 0.0  ;;  %v636_v25 = vld [vmem:[#allocation2 + $0x18] sm:$0xff]  ;;  %vm751_vm3 = vcmask 64512  }
  0xe1   : > { %v635_v26 = vld [vmem:[#allocation2 + $0xd8] sm:$0xff]  ;;  %249 = vst [vmem:[#allocation2 + $0xb0] sm:$0xf] %v247_v23  ;;  %250 = vst [vmem:[#allocation2] sm:$0xf] %v248_v24  ;;  %699 = vmatprep.subr.mxu0 %v636_v25 }
  0xe2   : > { %700 = vmatpush1.msra.mxu0 %v635_v26 }
  0xe8   : > { %v634_v12 = vld [vmem:[#allocation2] sm:$0xff]  ;;  %v633_v27 = vld [vmem:[#allocation2 + $0xb0] sm:$0xff] }
  0xe9   : > { %701 = vmatprep.subr.mxu0 %v634_v12 }
  0xea   : > { %702 = vmatpush1.msra.mxu0 %v633_v27 }
  0xeb   : > { %736 = vmatmul.mubr.f32.vlgmr.msra.gmra.mxu0 %v632_v5  ;;  %v669_v28 = vpop.permute.xlu0 %668 }
 0x117   : > { %v749_v6 = vpop.permute.xlu1 %748 }
 0x1ab   : > { %v737_v29 = vpop.f32.mrf.mxu0 }
 0x1ac   : > { %v738_v30 = vadd.f32 %v737_v29, %v669_v28 }
 0x1ad   : > { %v739_v31 = vpop.f32.mrf.mxu0 }
 0x1ae   : > { %v740_v32 = vadd.f32 %v739_v31, %v669_v28  ;;  %v742_v34 = vmax.f32 %v738_v30, 0.0 }
 0x1b0   : > { %v743_v33 = vmax.f32 %v740_v32, 0.0 }
 0x1b2   : > { %785 = vmatprep.subr.mxu1 %v743_v33 }
 0x1b3   : > { %786 = vmatpush1.msra.mxu1 %v742_v34 }
 0x1b4   : > { %896 = vmatmul.mubr.msk.f32.vlgmr.msra.gmra.mxu1 %vm751_vm3, %v744_v35 }
 0x274   : > { %v821_v36 = vpop.f32.mrf.mxu1 }
 0x275   : > { %v822_v38 = vadd.f32 %v821_v36, %v749_v6 }
 0x276   : > { %v823_v37 = vpop.f32.mrf.mxu1 }
 0x277   : > { %v824_v39 = vadd.f32 %v823_v37, %v749_v6 }
 0x279   : > { %v828_v40 = vcombine.low %v822_v38, %v824_v39 }
 0x27b   : > { %v830_v41 = vadd.f32 %v828_v40, %v1019_v1 }
 0x27d   : > { %831 = vst [vmem:[%s224_s11] sm:$0xff] %v830_v41 }
 0x27e PF: > { %s15_s18 = sadd.s32 1, %s945_s18  }
 0x27f   : > { %p12_p4 = scmp.ge.s32.totalorder %s15_s18, 4  }
 0x281   :  { %14 = sbr.rel (!%p12_p4) target bundleno = 1 (0x1), region = 70 }

</bundles_post_ra>
